<compile_context>
chip_gen: v5e
topology: v5e:2x2
jax: 0.10.0
libtpu: 0.0.40
codegen_flags: <defaults>
</compile_context>

<pallas_src>
import functools

import jax
import jax.numpy as jnp
from jax import lax
from jax.experimental import pallas as pl
from jax.experimental.pallas import tpu as pltpu


def _round_up(x, m):
    return (x + m - 1) // m * m


def _choose_n_pad(n):
    # Round generously so large, evenly dividing tiles always exist.
    if n <= 1024:
        return _round_up(n, 256)
    return _round_up(n, 512)


def _pick_tiles(n_pad, c_out_pad, vmem_budget):
    """Pick (tm, tk) for the aggregation kernel under a VMEM byte budget."""
    tm_cands = [t for t in (512, 256, 128) if n_pad % t == 0]
    # Keep >=2 row tiles when possible so the parallel axis can be sharded
    # across both TensorCores on v7x.
    multi = [t for t in tm_cands if n_pad // t >= 2]
    tm = (multi or tm_cands)[0]

    xw_bytes = 2 * n_pad * c_out_pad * 2      # resident bf16 XW (2 bufs, worst case)
    out_bytes = 2 * tm * c_out_pad * 4        # f32 output tile, double-buffered
    dis_bytes = 2 * tm * 128 * 4              # (tm,1) f32 padded to a lane

    tk = 128
    for cand in range(n_pad, 127, -128):      # largest divisor of n_pad that fits
        if n_pad % cand:
            continue
        a_bytes = 2 * tm * cand * 2           # bf16 A tile, double-buffered
        if a_bytes + xw_bytes + out_bytes + dis_bytes <= vmem_budget:
            tk = cand
            break
    return tm, tk


# ---------------------------------------------------------------------------
# Aggregation kernel:  out = d^{-1/2} * (A @ xw_scaled) + bias
#   grid = (n_pad/tm row tiles [parallel], n_pad/tk contraction tiles [arbitrary])
#   xw_scaled is fully resident in VMEM; the output block is the accumulator.
# ---------------------------------------------------------------------------
def _gcn_aggregate_kernel(adj_ref, xw_ref, dis_ref, b_ref, o_ref, *, tk):
    k = pl.program_id(1)

    @pl.when(k == 0)
    def _init():
        o_ref[...] = jnp.zeros_like(o_ref)

    start = pl.multiple_of(k * tk, 128)
    xw_tile = xw_ref[pl.ds(start, tk), :]          # slice of resident XW
    # bf16 x bf16 -> f32 accumulation on the MXU, directly into the output block.
    o_ref[...] += jnp.dot(adj_ref[...], xw_tile,
                          preferred_element_type=jnp.float32)

    @pl.when(k == pl.num_programs(1) - 1)
    def _finalize():
        o_ref[...] = o_ref[...] * dis_ref[...] + b_ref[...]


def gcn_conv(node_state, adj_mat, weight, bias):
    N, c_in = node_state.shape
    c_out = weight.shape[1]

    n_pad = _choose_n_pad(N)
    c_out_pad = _round_up(c_out, 128)

    # Per-generation VMEM budget (v5e/v6e: 128 MiB, v7x: 64 MiB physical).
    try:
        vmem_cap = int(pltpu.get_tpu_info().vmem_capacity_bytes)
    except Exception:
        vmem_cap = 64 * 1024 * 1024
    vmem_budget = int(vmem_cap * 0.6)
    vmem_limit = int(vmem_cap * 0.85)

    tm, tk = _pick_tiles(n_pad, c_out_pad, vmem_budget)

    # --- adjacency: single cast+pad pass to bf16 -----------------------------
    adj_p = jnp.pad(adj_mat.astype(jnp.bfloat16),
                    ((0, n_pad - N), (0, n_pad - N)))

    # --- normalization scalars: row sums of the bf16 adjacency (f32 accum) ---
    deg = jnp.sum(adj_p, axis=1, dtype=jnp.float32).reshape(n_pad, 1)
    d_inv_sqrt = jnp.where(deg > 0.0, lax.rsqrt(jnp.maximum(deg, 1e-12)), 0.0)

    # --- projection + column scaling of L (tiny GEMM) in plain XLA -----------
    xw = jnp.dot(node_state.astype(jnp.float32), weight.astype(jnp.float32))
    xw_scaled = xw * d_inv_sqrt[:N]
    xw_p = jnp.zeros((n_pad, c_out_pad), jnp.bfloat16).at[:N, :c_out].set(
        xw_scaled.astype(jnp.bfloat16))

    b_p = jnp.zeros((1, c_out_pad), jnp.float32).at[:, :c_out].set(
        bias.reshape(1, -1).astype(jnp.float32))

    kernel = functools.partial(_gcn_aggregate_kernel, tk=tk)

    out_p = pl.pallas_call(
        kernel,
        out_shape=jax.ShapeDtypeStruct((n_pad, c_out_pad), jnp.float32),
        grid_spec=pltpu.PrefetchScalarGridSpec(
            num_scalar_prefetch=0,
            grid=(n_pad // tm, n_pad // tk),
            in_specs=[
                pl.BlockSpec((tm, tk), lambda i, k: (i, k)),            # A tile
                pl.BlockSpec((n_pad, c_out_pad), lambda i, k: (0, 0)),  # resident XW
                pl.BlockSpec((tm, 1), lambda i, k: (i, 0)),             # d^{-1/2}
                pl.BlockSpec((1, c_out_pad), lambda i, k: (0, 0)),      # bias
            ],
            out_specs=pl.BlockSpec((tm, c_out_pad), lambda i, k: (i, 0)),
        ),
        compiler_params=pltpu.CompilerParams(
            dimension_semantics=("parallel", "arbitrary"),
            vmem_limit_bytes=vmem_limit),
    )(adj_p, xw_p, d_inv_sqrt, b_p)

    return out_p[:N, :c_out]


if __name__ == "__main__":
    # Small shapes consistent with the module: N nodes, in_channels, out_channels.
    N, C_IN, C_OUT = 64, 32, 16

    key = jax.random.PRNGKey(0)
    k_adj, k_x, k_w, k_b = jax.random.split(key, 4)

    # Random symmetric-ish adjacency with nonnegative weights.
    a = jax.random.uniform(k_adj, (N, N), dtype=jnp.float32)
    adj = (a + a.T) * 0.5
    adj = jnp.where(adj > 0.7, adj, 0.0)            # sparsify a bit

    node_state = jax.random.normal(k_x, (N, C_IN), dtype=jnp.float32)

    # GCNConv init_type='v1': uniform(-1/in_channels, 1/in_channels).
    bound = 1.0 / C_IN
    weight = jax.random.uniform(k_w, (C_IN, C_OUT), dtype=jnp.float32,
                                minval=-bound, maxval=bound)
    bias = jax.random.uniform(k_b, (C_OUT,), dtype=jnp.float32,
                              minval=-bound, maxval=bound)

    out = jax.jit(gcn_conv)(node_state, adj, weight, bias)
    out = jax.block_until_ready(out)

    # Pure-JAX f32 reference for sanity.  Tolerance reflects the bf16
    # streaming of the adjacency / XW operands (f32 accumulation).
    deg = jnp.sum(adj, axis=1, keepdims=True)
    d_inv_sqrt = jnp.where(deg > 0, 1.0 / jnp.sqrt(deg), 0.0)
    lap = d_inv_sqrt * adj * d_inv_sqrt.T
    ref = lap @ node_state @ weight + bias
    assert out.shape == ref.shape, "shape mismatch vs reference"
    assert jnp.allclose(out, ref, atol=2e-3, rtol=2e-2), "mismatch vs reference"

    print("KERNEL_OK")
</pallas_src>

<mosaic_0001>
module attributes {stable_mosaic.version = 11 : i64} {
  func.func @_gcn_aggregate_kernel(%arg0: i32, %arg1: i32, %arg2: memref<128x256xbf16, #tpu.memory_space<vmem>>, %arg3: memref<256x128xbf16, #tpu.memory_space<vmem>>, %arg4: memref<128x1xf32, #tpu.memory_space<vmem>>, %arg5: memref<1x128xf32, #tpu.memory_space<vmem>>, %arg6: memref<128x128xf32, #tpu.memory_space<vmem>>) attributes {dimension_semantics = [#tpu.dimension_semantics<parallel>, #tpu.dimension_semantics<arbitrary>], iteration_bounds = array<i64: 2, 1>, scalar_prefetch = 0 : i64, scratch_operands = 0 : i64, tpu.core_type = #tpu.core_type<tc>, window_params = [{transform_indices = @transform_0, window_bounds = array<i64: 128, 256>}, {pipeline_mode = #tpu.pipeline_mode<synchronous>, transform_indices = @transform_1, window_bounds = array<i64: 256, 128>}, {transform_indices = @transform_2, window_bounds = array<i64: 128, 1>}, {pipeline_mode = #tpu.pipeline_mode<synchronous>, transform_indices = @transform_3, window_bounds = array<i64: 1, 128>}, {transform_indices = @transform_4, window_bounds = array<i64: 128, 128>}]} {
    %c0_i32 = arith.constant 0 : i32
    %0 = arith.cmpi eq, %arg1, %c0_i32 : i32
    %1 = arith.extui %0 : i1 to i32
    %c0_i32_0 = arith.constant 0 : i32
    %2 = arith.cmpi ne, %1, %c0_i32_0 : i32
    scf.if %2 {
      %cst_9 = arith.constant 0.000000e+00 : f32
      %15 = vector.broadcast %cst_9 : f32 to vector<128x128xf32>
      %c0_10 = arith.constant 0 : index
      %c0_11 = arith.constant 0 : index
      %16 = vector.load %arg6[%c0_10, %c0_11] : memref<128x128xf32, #tpu.memory_space<vmem>>, vector<128x128xf32>
      tpu.vector_store %arg6[%c0_10, %c0_11], %15 {strides = array<i32>} : memref<128x128xf32, #tpu.memory_space<vmem>>, vector<128x128xf32>,
    } else {
    }
    %c256_i32 = arith.constant 256 : i32
    %3 = arith.muli %arg1, %c256_i32 : i32
    %4 = tpu.assume_multiple %3, 128 : i32
    %5 = arith.index_cast %4 : i32 to index
    %c0 = arith.constant 0 : index
    %6 = vector.load %arg3[%5, %c0] : memref<256x128xbf16, #tpu.memory_space<vmem>>, vector<256x128xbf16>
    %c0_1 = arith.constant 0 : index
    %c0_2 = arith.constant 0 : index
    %7 = vector.load %arg6[%c0_1, %c0_2] : memref<128x128xf32, #tpu.memory_space<vmem>>, vector<128x128xf32>
    %c0_3 = arith.constant 0 : index
    %c0_4 = arith.constant 0 : index
    %8 = vector.load %arg2[%c0_3, %c0_4] : memref<128x256xbf16, #tpu.memory_space<vmem>>, vector<128x256xbf16>
    %cst = arith.constant dense<0.000000e+00> : vector<128x128xf32>
    %9 = tpu.matmul %8, %6, %cst {dimension_numbers = #tpu.dot_dimension_numbers<[1], [0], [0], [1], [0, 0, 1, 1], [], []>} : vector<128x256xbf16>, vector<256x128xbf16>, vector<128x128xf32> -> vector<128x128xf32>
    %10 = arith.addf %7, %9 : vector<128x128xf32>
    %c0_5 = arith.constant 0 : index
    %c0_6 = arith.constant 0 : index
    %11 = vector.load %arg6[%c0_5, %c0_6] : memref<128x128xf32, #tpu.memory_space<vmem>>, vector<128x128xf32>
    tpu.vector_store %arg6[%c0_5, %c0_6], %10 {strides = array<i32>} : memref<128x128xf32, #tpu.memory_space<vmem>>, vector<128x128xf32>,
    %c0_i32_7 = arith.constant 0 : i32
    %12 = arith.cmpi eq, %arg1, %c0_i32_7 : i32
    %13 = arith.extui %12 : i1 to i32
    %c0_i32_8 = arith.constant 0 : i32
    %14 = arith.cmpi ne, %13, %c0_i32_8 : i32
    scf.if %14 {
      %c0_9 = arith.constant 0 : index
      %c0_10 = arith.constant 0 : index
      %15 = vector.load %arg6[%c0_9, %c0_10] : memref<128x128xf32, #tpu.memory_space<vmem>>, vector<128x128xf32>
      %c0_11 = arith.constant 0 : index
      %c0_12 = arith.constant 0 : index
      %16 = vector.load %arg4[%c0_11, %c0_12] : memref<128x1xf32, #tpu.memory_space<vmem>>, vector<128x1xf32>
      %17 = vector.broadcast %16 : vector<128x1xf32> to vector<128x128xf32>
      %18 = arith.mulf %15, %17 : vector<128x128xf32>
      %c0_13 = arith.constant 0 : index
      %c0_14 = arith.constant 0 : index
      %19 = vector.load %arg5[%c0_13, %c0_14] : memref<1x128xf32, #tpu.memory_space<vmem>>, vector<1x128xf32>
      %20 = vector.broadcast %19 : vector<1x128xf32> to vector<128x128xf32>
      %21 = arith.addf %18, %20 : vector<128x128xf32>
      %c0_15 = arith.constant 0 : index
      %c0_16 = arith.constant 0 : index
      %22 = vector.load %arg6[%c0_15, %c0_16] : memref<128x128xf32, #tpu.memory_space<vmem>>, vector<128x128xf32>
      tpu.vector_store %arg6[%c0_15, %c0_16], %21 {strides = array<i32>} : memref<128x128xf32, #tpu.memory_space<vmem>>, vector<128x128xf32>,
    } else {
    }
    return
  }
  func.func @transform_0(%arg0: i32, %arg1: i32) -> (i32, i32) {
    %c0_i32 = arith.constant 0 : i32
    return %arg0, %arg1 : i32, i32
  }
  func.func @transform_1(%arg0: i32, %arg1: i32) -> (i32, i32) {
    %c0_i32 = arith.constant 0 : i32
    %c0_i32_0 = arith.constant 0 : i32
    %c0_i32_1 = arith.constant 0 : i32
    return %c0_i32, %c0_i32_0 : i32, i32
  }
  func.func @transform_2(%arg0: i32, %arg1: i32) -> (i32, i32) {
    %c0_i32 = arith.constant 0 : i32
    %c0_i32_0 = arith.constant 0 : i32
    return %arg0, %c0_i32 : i32, i32
  }
  func.func @transform_3(%arg0: i32, %arg1: i32) -> (i32, i32) {
    %c0_i32 = arith.constant 0 : i32
    %c0_i32_0 = arith.constant 0 : i32
    %c0_i32_1 = arith.constant 0 : i32
    return %c0_i32, %c0_i32_0 : i32, i32
  }
  func.func @transform_4(%arg0: i32, %arg1: i32) -> (i32, i32) {
    %c0_i32 = arith.constant 0 : i32
    %c0_i32_0 = arith.constant 0 : i32
    return %arg0, %c0_i32 : i32, i32
  }
}

</mosaic_0001>

<bundles_post_ra>
// kernel: gcn_conv.1
= control target key start
LH: loop header
LB: loop body
LE: loop exit
PB: predicated region body
PF: predicated region fallthrough
CT: control target
= control target key end

     0   :  { %s1172_s15 = smov 0   ;;  %s1174_s16 = smov 0   ;;  %s1364_s0 = inlined_call_operand.vmem [shape: bf16[256,256], index: 0, kind: input, shape index: {}]   ;;  %s1365_s1 = inlined_call_operand.vmem [shape: bf16[256,128], index: 1, kind: input, shape index: {}]   ;;  %s1366_s2 = inlined_call_operand.vmem [shape: f32[256,1], index: 2, kind: input, shape index: {}]   ;;  %s1367_s3 = inlined_call_operand.vmem [shape: f32[1,128], index: 3, kind: input, shape index: {}]   ;;  %s1368_s4 = inlined_call_operand.vmem [shape: f32[256,128], index: 4, kind: output, shape index: {}]  }
   0x1   :  { %s1176_s17 = smov 0  }
   0x2 LB: > { %s26_s18 = sadd.s32 1, %s1140_s16  ;;  %p905_p0 = scmp.ge.s32.totalorder %s1144_s17, 1  ;;  %s1144_s17 = sphi %s1176_s17, %s14_s17   ;;  %s1140_s16 = sphi %s1174_s16, %s1370_s16   ;;  %s1136_s15 = sphi %s1172_s15, %s1369_s15  }
   0x3   : > { %p28_p1 = scmp.ge.s32.totalorder %s26_s18, 2  ;;  %p194_p2 = scmp.lt.s32.totalorder %s1144_s17, 3 }
   0x5   : > { %s1372_s18 = smov (%p28_p1, %s26_s18), 0  ;;  %p195_p3 = pnand %p905_p0, %p194_p2 }
   0x6   : > { %s906_s23 = sshll.u32 (!%p195_p3), %s1136_s15, 4 }
   0x7   : > { %198 = sbr.rel (%p195_p3) target bundleno = 241 (0xf1), region = 36  ;;  %p232_p4 = scmp.lt.s32.totalorder (!%p195_p3), %s906_s23, 31 }
   0xc   : > { %v1051_v0 = vld [vmem:[%s1365_s1 + $0x38] sm:$0xff]  ;;  %v1146_v2 = vmov 0   ;;  %v1050_v3 = vld [vmem:[%s1365_s1 + $0x30] sm:$0xff]  ;;  %s1374_s23 = smov (!%p232_p4, %s906_s23), 31  ;;  %v1049_v5 = vld [vmem:[%s1365_s1 + $0x28] sm:$0xff] }
   0xd   : > { %v1059_v1 = vld [vmem:[%s1365_s1 + $0x78] sm:$0xff]  ;;  %1118 = vset.pattern.permute.xlu0 %v1146_v2  ;;  %1119 = vset.pattern.permute.xlu1 %v1146_v2  ;;  %v1058_v4 = vld [vmem:[%s1365_s1 + $0x70] sm:$0xff]  ;;  %s1202_s28 = sshll.u32 %s1374_s23, 3  ;;  %v1057_v6 = vld [vmem:[%s1365_s1 + $0x68] sm:$0xff] }
   0xe   : > { %519 = vmatpush.bf16.msra.mxu0 %v1051_v0  ;;  %1076 = vmatpush.bf16.msra.mxu2 %v1051_v0  ;;  %s1214_s9 = scalar_lea.vmem %s1366_s2, %s1202_s28  ;;  %v1048_v8 = vld [vmem:[%s1365_s1 + $0x20] sm:$0xff]  ;;  %v1047_v10 = vld [vmem:[%s1365_s1 + $0x18] sm:$0xff]  ;;  %v1046_v14 = vld [vmem:[%s1365_s1 + $0x10] sm:$0xff]  ;;  %s1245_s30 = scalar_lea.vmem %s1364_s0, %s1202_s28 }
   0xf   : > { %568 = vmatpush.bf16.msra.mxu1 %v1059_v1  ;;  %1084 = vmatpush.bf16.msra.mxu3 %v1059_v1  ;;  %v668_v7 = vld [vmem:[%s1214_s9] sm:$0xff]  ;;  %v670_v11 = vld [vmem:[%s1214_s9 + $0x10] sm:$0xff]  ;;  %v1055_v12 = vld [vmem:[%s1365_s1 + $0x58] sm:$0xff]  ;;  %s1313_s15 = scalar_lea.vmem %s1368_s4, %s1202_s28 }
  0x10   : > { %1120 = vset.pattern.permute.xlu2 %v1146_v2  ;;  %v1056_v9 = vld [vmem:[%s1365_s1 + $0x60] sm:$0xff]  ;;  %686 = vperm.xlu0 %1118, %v668_v7   ;;  %v669_v13 = vld [vmem:[%s1214_s9 + $0x8] sm:$0xff]  ;;  %v1054_v15 = vld [vmem:[%s1365_s1 + $0x50] sm:$0xff] }
  0x11   : > { %696 = vperm.xlu1 %1119, %v670_v11   ;;  %v671_v16 = vld [vmem:[%s1214_s9 + $0x18] sm:$0xff]  ;;  %v1045_v17 = vld [vmem:[%s1365_s1 + $0x8] sm:$0xff]  ;;  %v1044_v19 = vld [vmem:[%s1365_s1] sm:$0xff] }
  0x12   : > { %520 = vmatpush.bf16.msra.mxu0 %v1050_v3  ;;  %1077 = vmatpush.bf16.msra.mxu2 %v1050_v3  ;;  %v1053_v18 = vld [vmem:[%s1365_s1 + $0x48] sm:$0xff]  ;;  %v1052_v20 = vld [vmem:[%s1365_s1 + $0x40] sm:$0xff]  ;;  %v674_v23 = vld [vmem:[%s1214_s9 + $0x30] sm:$0xff] }
  0x13   : > { %569 = vmatpush.bf16.msra.mxu1 %v1058_v4  ;;  %1085 = vmatpush.bf16.msra.mxu3 %v1058_v4  ;;  %v915_v21 = vld [vmem:[%s1245_s30] sm:$0xf]  ;;  %v1061_v22 = vld [vmem:[%s1245_s30 + $0x4] sm:$0xf0]  ;;  %v1060_v26 = vld [vmem:[%s1245_s30 + $0x4] sm:$0xf] }
  0x14   : > { %v947_v24 = vld [vmem:[%s1245_s30 + $0x40] sm:$0xf]  ;;  %v1069_v25 = vld [vmem:[%s1245_s30 + $0x44] sm:$0xf0]  ;;  %v917_v27 = vld [vmem:[%s1245_s30 + $0x8] sm:$0xf0]  ;;  %v916_v30 = vor.u32 %v1061_v22, %v915_v21 }
  0x15   : > { %v1068_v28 = vld [vmem:[%s1245_s30 + $0x44] sm:$0xf]  ;;  %v949_v29 = vld [vmem:[%s1245_s30 + $0x48] sm:$0xf0]  ;;  %v948_v31 = vor.u32 %v1069_v25, %v947_v24  ;;  %v920_v32 = vor.u32 %v1060_v26, %v917_v27  ;;  %v675_v35 = vld [vmem:[%s1214_s9 + $0x38] sm:$0xff] }
  0x16   : > { %521 = vmatpush.bf16.msra.mxu0 %v1049_v5  ;;  %1078 = vmatpush.bf16.msra.mxu2 %v1049_v5  ;;  %v952_v33 = vor.u32 %v1068_v28, %v949_v29  ;;  %v672_v34 = vld [vmem:[%s1214_s9 + $0x20] sm:$0xff]  ;;  %v677_v36 = vld [vmem:[%s1214_s9 + $0x48] sm:$0xff]  ;;  %v678_v38 = vld [vmem:[%s1214_s9 + $0x50] sm:$0xff] }
  0x17   : > { %570 = vmatpush.bf16.msra.mxu1 %v1057_v6  ;;  %1086 = vmatpush.bf16.msra.mxu3 %v1057_v6  ;;  %v673_v37 = vld [vmem:[%s1214_s9 + $0x28] sm:$0xff]  ;;  %v923_v39 = vld [vmem:[%s1245_s30 + $0x10] sm:$0xf]  ;;  %v1063_v40 = vld [vmem:[%s1245_s30 + $0x14] sm:$0xf0] }
  0x18   : > { %691 = vperm.xlu0 %1118, %v669_v13   ;;  %706 = vperm.xlu2 %1120, %v672_v34   ;;  %v680_v41 = vld [vmem:[%s1214_s9 + $0x60] sm:$0xff]  ;;  %v955_v42 = vld [vmem:[%s1245_s30 + $0x50] sm:$0xf]  ;;  %v1071_v43 = vld [vmem:[%s1245_s30 + $0x54] sm:$0xf0]  ;;  %v924_v48 = vor.u32 %v1063_v40, %v923_v39 }
  0x19   : > { %701 = vperm.xlu1 %1119, %v671_v16   ;;  %v1062_v44 = vld [vmem:[%s1245_s30 + $0x14] sm:$0xf]  ;;  %v925_v45 = vld [vmem:[%s1245_s30 + $0x18] sm:$0xf0]  ;;  %v956_v49 = vor.u32 %v1071_v43, %v955_v42  ;;  %v676_v52 = vld [vmem:[%s1214_s9 + $0x40] sm:$0xff] }
  0x1a   : > { %522 = vmatpush.bf16.msra.mxu0 %v1048_v8  ;;  %1079 = vmatpush.bf16.msra.mxu2 %v1048_v8  ;;  %v1070_v46 = vld [vmem:[%s1245_s30 + $0x54] sm:$0xf]  ;;  %v957_v47 = vld [vmem:[%s1245_s30 + $0x58] sm:$0xf0]  ;;  %v928_v50 = vor.u32 %v1062_v44, %v925_v45  ;;  %v681_v53 = vld [vmem:[%s1214_s9 + $0x68] sm:$0xff] }
  0x1b   : > { %571 = vmatpush.bf16.msra.mxu1 %v1056_v9  ;;  %1087 = vmatpush.bf16.msra.mxu3 %v1056_v9  ;;  %v960_v51 = vor.u32 %v1070_v46, %v957_v47  ;;  %v683_v54 = vld [vmem:[%s1214_s9 + $0x78] sm:$0xff]  ;;  %v931_v56 = vld [vmem:[%s1245_s30 + $0x20] sm:$0xf]  ;;  %v1065_v57 = vld [vmem:[%s1245_s30 + $0x24] sm:$0xf0] }
  0x1c   : > { %v679_v55 = vld [vmem:[%s1214_s9 + $0x58] sm:$0xff]  ;;  %v963_v58 = vld [vmem:[%s1245_s30 + $0x60] sm:$0xf]  ;;  %v1073_v59 = vld [vmem:[%s1245_s30 + $0x64] sm:$0xf0]  ;;  %v932_v0 = vor.u32 %v1065_v57, %v931_v56 }
  0x1d   : > { %v1064_v60 = vld [vmem:[%s1245_s30 + $0x24] sm:$0xf]  ;;  %v933_v61 = vld [vmem:[%s1245_s30 + $0x28] sm:$0xf0]  ;;  %v964_v1 = vor.u32 %v1073_v59, %v963_v58  ;;  %v682_v2 = vld [vmem:[%s1214_s9 + $0x70] sm:$0xff] }
  0x1e   : > { %523 = vmatpush.bf16.msra.mxu0 %v1047_v10  ;;  %1080 = vmatpush.bf16.msra.mxu2 %v1047_v10  ;;  %v1072_v62 = vld [vmem:[%s1245_s30 + $0x64] sm:$0xf]  ;;  %v965_v63 = vld [vmem:[%s1245_s30 + $0x68] sm:$0xf0]  ;;  %v936_v3 = vor.u32 %v1064_v60, %v933_v61  ;;  %v939_v5 = vld [vmem:[%s1245_s30 + $0x30] sm:$0xf] }
  0x1f   : > { %572 = vmatpush.bf16.msra.mxu1 %v1055_v12  ;;  %1088 = vmatpush.bf16.msra.mxu3 %v1055_v12  ;;  %v968_v4 = vor.u32 %v1072_v62, %v965_v63  ;;  %v1067_v6 = vld [vmem:[%s1245_s30 + $0x34] sm:$0xf0]  ;;  %v971_v7 = vld [vmem:[%s1245_s30 + $0x70] sm:$0xf]  ;;  %v1066_v9 = vld [vmem:[%s1245_s30 + $0x34] sm:$0xf] }
  0x20   : > { %716 = vperm.xlu0 %1118, %v674_v23   ;;  %711 = vperm.xlu2 %1120, %v673_v37   ;;  %v1075_v8 = vld [vmem:[%s1245_s30 + $0x74] sm:$0xf0]  ;;  %v941_v10 = vld [vmem:[%s1245_s30 + $0x38] sm:$0xf0]  ;;  %v1074_v11 = vld [vmem:[%s1245_s30 + $0x74] sm:$0xf]  ;;  %v940_v13 = vor.u32 %v1067_v6, %v939_v5 }
  0x21   : > { %721 = vperm.xlu1 %1119, %v675_v35   ;;  %v973_v12 = vld [vmem:[%s1245_s30 + $0x78] sm:$0xf0]  ;;  %v1307_v25 = vld [vmem:[%s1367_s3] ss:$0 sm:$0xff] }
  0x22   : > { %524 = vmatpush.bf16.msra.mxu0 %v1046_v14  ;;  %1081 = vmatpush.bf16.msra.mxu2 %v1046_v14  ;;  %v972_v14 = vor.u32 %v1075_v8, %v971_v7  ;;  %v976_v16 = vor.u32 %v1074_v11, %v973_v12 }
  0x23   : > { %573 = vmatpush.bf16.msra.mxu1 %v1054_v15  ;;  %1089 = vmatpush.bf16.msra.mxu3 %v1054_v15  ;;  %v944_v15 = vor.u32 %v1066_v9, %v941_v10 }
  0x26   : > { %525 = vmatpush.bf16.msra.mxu0 %v1045_v17  ;;  %1082 = vmatpush.bf16.msra.mxu2 %v1045_v17 }
  0x27   : > { %574 = vmatpush.bf16.msra.mxu1 %v1053_v18  ;;  %1090 = vmatpush.bf16.msra.mxu3 %v1053_v18 }
  0x28   : > { %731 = vperm.xlu0 %1118, %v677_v36   ;;  %726 = vperm.xlu2 %1120, %v676_v52  }
  0x29   : > { %736 = vperm.xlu1 %1119, %v678_v38  }
  0x2a   : > { %526 = vmatpush.bf16.msra.mxu0 %v1044_v19  ;;  %1083 = vmatpush.bf16.msra.mxu2 %v1044_v19 }
  0x2b   : > { %575 = vmatpush.bf16.msra.mxu1 %v1052_v20  ;;  %1091 = vmatpush.bf16.msra.mxu3 %v1052_v20 }
  0x2d   : > { %527 = vmatmul.bf16.vlgmr.msra.gmra.mxu0 %v916_v30  ;;  %547 = vmatmul.bf16.vlgmr.msra.gmra.mxu2 %v948_v31 }
  0x2e   : > { %576 = vmatmul.bf16.vlgmr.msra.gmra.mxu1 %v920_v32  ;;  %596 = vmatmul.bf16.vlgmr.msra.gmra.mxu3 %v952_v33 }
  0x30   : > { %746 = vperm.xlu0 %1118, %v680_v41   ;;  %741 = vperm.xlu2 %1120, %v679_v55  }
  0x31   : > { %751 = vperm.xlu1 %1119, %v681_v53  }
  0x38   : > { %761 = vperm.xlu0 %1118, %v683_v54   ;;  %756 = vperm.xlu2 %1120, %v682_v2  }
  0x3d   : > { %532 = vmatmul.bf16.gmra.mxu0 %v924_v48  ;;  %552 = vmatmul.bf16.gmra.mxu2 %v956_v49 }
  0x3e   : > { %581 = vmatmul.bf16.gmra.mxu1 %v928_v50  ;;  %601 = vmatmul.bf16.gmra.mxu3 %v960_v51 }
  0x4d   : > { %537 = vmatmul.bf16.gmra.mxu0 %v932_v0  ;;  %557 = vmatmul.bf16.gmra.mxu2 %v964_v1 }
  0x4e   : > { %586 = vmatmul.bf16.gmra.mxu1 %v936_v3  ;;  %606 = vmatmul.bf16.gmra.mxu3 %v968_v4 }
  0x5d   : > { %542 = vmatmul.bf16.gmra.mxu0 %v940_v13  ;;  %562 = vmatmul.bf16.gmra.mxu2 %v972_v14 }
  0x5e   : > { %591 = vmatmul.bf16.gmra.mxu1 %v944_v15  ;;  %611 = vmatmul.bf16.gmra.mxu3 %v976_v16 }
  0x72   : > { %v1300_v17 = vpop.permute.xlu2 %706 }
  0x7a   : > { %v1302_v20 = vpop.permute.xlu2 %711 }
  0x82   : > { %v687_v18 = vpop.permute.xlu0 %686  ;;  %v727_v33 = vpop.permute.xlu2 %726 }
  0x83   : > { %v697_v19 = vpop.permute.xlu1 %696 }
  0x8a   : > { %v692_v21 = vpop.permute.xlu0 %691  ;;  %v742_v6 = vpop.permute.xlu2 %741 }
  0x8b   : > { %v702_v26 = vpop.permute.xlu1 %701 }
  0x92   : > { %v1316_v35 = vpop.permute.xlu0 %716 }
  0x93   : > { %v1320_v42 = vpop.permute.xlu1 %721 }
  0x9a   : > { %v732_v48 = vpop.permute.xlu0 %731 }
  0x9b   : > { %v737_v58 = vpop.permute.xlu1 %736 }
  0xaa   : > { %v528_v22 = vpop.f32.mrf.mxu0 }
  0xab   : > { %v577_v23 = vpop.f32.mrf.mxu1 }
  0xac   : > { %v578_v24 = vadd.f32 %v577_v23, %v528_v22 }
  0xae   : > { %v764_v27 = vmul.f32 %v687_v18, %v578_v24  ;;  %v747_v18 = vpop.permute.xlu0 %746 }
  0xb0   : > { %v548_v28 = vpop.f32.mrf.mxu2  ;;  %v784_v30 = vadd.f32 %v1307_v25, %v764_v27 }
  0xb1   : > { %v597_v29 = vpop.f32.mrf.mxu3 }
  0xb2   : > { %v598_v31 = vadd.f32 %v597_v29, %v548_v28  ;;  %v530_v32 = vpop.f32.mrf.mxu0  ;;  %800 = vst [vmem:[%s1313_s15] sm:$0xff] %v784_v30  ;;  %v752_v30 = vpop.permute.xlu1 %751 }
  0xb3   : > { %v579_v34 = vpop.f32.mrf.mxu1 }
  0xb4   : > { %v580_v36 = vadd.f32 %v579_v34, %v530_v32  ;;  %v772_v37 = vmul.f32 %v727_v33, %v598_v31 }
  0xb6   : > { %v765_v38 = vmul.f32 %v692_v21, %v580_v36  ;;  %v792_v40 = vadd.f32 %v1307_v25, %v772_v37 }
  0xb8   : > { %v550_v39 = vpop.f32.mrf.mxu2  ;;  %v785_v43 = vadd.f32 %v1307_v25, %v765_v38  ;;  %808 = vst [vmem:[%s1313_s15 + $0x40] sm:$0xff] %v792_v40 }
  0xb9   : > { %v599_v41 = vpop.f32.mrf.mxu3 }
  0xba   : > { %v600_v44 = vadd.f32 %v599_v41, %v550_v39  ;;  %v533_v45 = vpop.f32.mrf.mxu0  ;;  %801 = vst [vmem:[%s1313_s15 + $0x8] sm:$0xff] %v785_v43  ;;  %v757_v41 = vpop.permute.xlu2 %756 }
  0xbb   : > { %v582_v46 = vpop.f32.mrf.mxu1 }
  0xbc   : > { %v583_v47 = vadd.f32 %v582_v46, %v533_v45  ;;  %v773_v49 = vmul.f32 %v732_v48, %v600_v44 }
  0xbe   : > { %v766_v50 = vmul.f32 %v697_v19, %v583_v47  ;;  %v793_v51 = vadd.f32 %v1307_v25, %v773_v49  ;;  %v762_v49 = vpop.permute.xlu0 %761 }
  0xc0   : > { %v553_v52 = vpop.f32.mrf.mxu2  ;;  %v786_v54 = vadd.f32 %v1307_v25, %v766_v50  ;;  %809 = vst [vmem:[%s1313_s15 + $0x48] sm:$0xff] %v793_v51 }
  0xc1   : > { %v602_v53 = vpop.f32.mrf.mxu3 }
  0xc2   : > { %v603_v55 = vadd.f32 %v602_v53, %v553_v52  ;;  %v535_v56 = vpop.f32.mrf.mxu0  ;;  %802 = vst [vmem:[%s1313_s15 + $0x10] sm:$0xff] %v786_v54 }
  0xc3   : > { %v584_v57 = vpop.f32.mrf.mxu1 }
  0xc4   : > { %v585_v59 = vadd.f32 %v584_v57, %v535_v56  ;;  %v774_v60 = vmul.f32 %v737_v58, %v603_v55 }
  0xc6   : > { %v767_v61 = vmul.f32 %v702_v26, %v585_v59  ;;  %v794_v63 = vadd.f32 %v1307_v25, %v774_v60 }
  0xc8   : > { %v555_v62 = vpop.f32.mrf.mxu2  ;;  %v787_v1 = vadd.f32 %v1307_v25, %v767_v61  ;;  %810 = vst [vmem:[%s1313_s15 + $0x50] sm:$0xff] %v794_v63 }
  0xc9   : > { %v604_v0 = vpop.f32.mrf.mxu3 }
  0xca   : > { %v605_v2 = vadd.f32 %v604_v0, %v555_v62  ;;  %v538_v3 = vpop.f32.mrf.mxu0  ;;  %803 = vst [vmem:[%s1313_s15 + $0x18] sm:$0xff] %v787_v1 }
  0xcb   : > { %v587_v4 = vpop.f32.mrf.mxu1 }
  0xcc   : > { %v588_v5 = vadd.f32 %v587_v4, %v538_v3  ;;  %v775_v7 = vmul.f32 %v742_v6, %v605_v2 }
  0xce   : > { %v768_v8 = vmul.f32 %v1300_v17, %v588_v5  ;;  %v795_v9 = vadd.f32 %v1307_v25, %v775_v7 }
  0xd0   : > { %v558_v10 = vpop.f32.mrf.mxu2  ;;  %v788_v12 = vadd.f32 %v1307_v25, %v768_v8  ;;  %811 = vst [vmem:[%s1313_s15 + $0x58] sm:$0xff] %v795_v9 }
  0xd1   : > { %v607_v11 = vpop.f32.mrf.mxu3 }
  0xd2   : > { %v608_v13 = vadd.f32 %v607_v11, %v558_v10  ;;  %v540_v14 = vpop.f32.mrf.mxu0  ;;  %804 = vst [vmem:[%s1313_s15 + $0x20] sm:$0xff] %v788_v12 }
  0xd3   : > { %v589_v15 = vpop.f32.mrf.mxu1 }
  0xd4   : > { %v590_v16 = vadd.f32 %v589_v15, %v540_v14  ;;  %v776_v19 = vmul.f32 %v747_v18, %v608_v13 }
  0xd6   : > { %v796_v21 = vadd.f32 %v1307_v25, %v776_v19  ;;  %v769_v17 = vmul.f32 %v1302_v20, %v590_v16 }
  0xd8   : > { %v560_v22 = vpop.f32.mrf.mxu2  ;;  %812 = vst [vmem:[%s1313_s15 + $0x60] sm:$0xff] %v796_v21  ;;  %v789_v24 = vadd.f32 %v1307_v25, %v769_v17 }
  0xd9   : > { %v609_v23 = vpop.f32.mrf.mxu3 }
  0xda   : > { %v610_v26 = vadd.f32 %v609_v23, %v560_v22  ;;  %v543_v27 = vpop.f32.mrf.mxu0  ;;  %805 = vst [vmem:[%s1313_s15 + $0x28] sm:$0xff] %v789_v24 }
  0xdb   : > { %v592_v28 = vpop.f32.mrf.mxu1 }
  0xdc   : > { %v593_v29 = vadd.f32 %v592_v28, %v543_v27  ;;  %v777_v31 = vmul.f32 %v752_v30, %v610_v26 }
  0xde   : > { %v797_v32 = vadd.f32 %v1307_v25, %v777_v31  ;;  %v770_v33 = vmul.f32 %v1316_v35, %v593_v29 }
  0xe0   : > { %v563_v20 = vpop.f32.mrf.mxu2  ;;  %813 = vst [vmem:[%s1313_s15 + $0x68] sm:$0xff] %v797_v32  ;;  %v790_v36 = vadd.f32 %v1307_v25, %v770_v33 }
  0xe1   : > { %v612_v34 = vpop.f32.mrf.mxu3 }
  0xe2   : > { %v613_v37 = vadd.f32 %v612_v34, %v563_v20  ;;  %v545_v38 = vpop.f32.mrf.mxu0  ;;  %806 = vst [vmem:[%s1313_s15 + $0x30] sm:$0xff] %v790_v36 }
  0xe3   : > { %v594_v39 = vpop.f32.mrf.mxu1 }
  0xe4   : > { %v595_v40 = vadd.f32 %v594_v39, %v545_v38  ;;  %v778_v43 = vmul.f32 %v757_v41, %v613_v37 }
  0xe6   : > { %v798_v44 = vadd.f32 %v1307_v25, %v778_v43  ;;  %v771_v45 = vmul.f32 %v1320_v42, %v595_v40 }
  0xe8   : > { %v565_v35 = vpop.f32.mrf.mxu2  ;;  %814 = vst [vmem:[%s1313_s15 + $0x70] sm:$0xff] %v798_v44  ;;  %v791_v47 = vadd.f32 %v1307_v25, %v771_v45 }
  0xe9   : > { %v614_v46 = vpop.f32.mrf.mxu3 }
  0xea   : > { %v615_v48 = vadd.f32 %v614_v46, %v565_v35  ;;  %807 = vst [vmem:[%s1313_s15 + $0x38] sm:$0xff] %v791_v47 }
  0xec   : > { %v779_v50 = vmul.f32 %v762_v49, %v615_v48 }
  0xee   : > { %v799_v51 = vadd.f32 %v1307_v25, %v779_v50 }
  0xf0   : > { %815 = vst [vmem:[%s1313_s15 + $0x78] sm:$0xff] %v799_v51 }
  0xf1 PF: > { %s14_s17 = sadd.s32 1, %s1144_s17   ;;  %s1369_s15 = smov %s1140_s16 }
  0xf2   : > { %p11_p5 = scmp.ge.s32.totalorder %s14_s17, 4   ;;  %s1370_s16 = smov %s1372_s18 }
  0xf4   :  { %13 = sbr.rel (!%p11_p5) target bundleno = 2 (0x2), region = 78 }

</bundles_post_ra>
